<compile_context>
chip_gen: v7x
topology: tpu7x:2x2x1
jax: 0.10.0
libtpu: 0.0.40
codegen_flags: <defaults>
</compile_context>

<pallas_src>
import jax
import jax.numpy as jnp
from jax.experimental import pallas as pl
from jax.experimental.pallas import tpu as pltpu


def embeddings_kernel(x_ref, w_ref, pos_ref, o_ref):
    # x_ref:   (tm, D_in)   current row tile of the flattened (B*L) rows
    # w_ref:   (D_in, tn)   weight column tile (resident across row tiles)
    # pos_ref: (Lp, tn)     pos+bias; Lp == L (broadcast path) or Lp == tm
    # o_ref:   (tm, tn)
    tm, tn = o_ref.shape
    lp = pos_ref.shape[0]

    # One big MXU matmul per grid step, f32 accumulate.
    y = jnp.dot(x_ref[...], w_ref[...], preferred_element_type=jnp.float32)

    pos = pos_ref[...]
    if lp == tm:
        # pos rows already match the tile (bt == 1, or wrapper pre-tiled).
        y = y + pos
    else:
        # tm is a static multiple of lp and lp % 8 == 0, so this reshape is a
        # free sublane-aligned view; broadcast add instead of per-step tiling.
        y = (y.reshape(tm // lp, lp, tn) + pos[None, :, :]).reshape(tm, tn)

    o_ref[...] = y.astype(o_ref.dtype)


def _choose_row_tile(B, L, target_rows=512):
    """Pick tm = bt*L rows per tile.

    Constraints: bt divides B (exact pos periodicity + even grid), tm % 8 == 0
    (sublane aligned) unless tm == B*L, tm <= target_rows when possible, and
    bt < B whenever B > 1 so the row grid has >= 2 steps (v7x: 2 TensorCores).
    """
    M = B * L
    divisors = [d for d in range(1, B + 1) if B % d == 0]

    def ok(bt):
        tm = bt * L
        return tm % 8 == 0 or tm == M

    multi = [bt for bt in divisors if bt < B and ok(bt)]   # >= 2 grid steps
    pool = multi if multi else [bt for bt in divisors if ok(bt)]
    under = [bt for bt in pool if bt * L <= target_rows]
    bt = max(under) if under else min(pool)
    return bt * L


def _choose_col_tile(H, target_cols=512):
    """Hidden tile: a 128-multiple divisor of H when possible, else full H."""
    if H % 128 != 0:
        return H          # full-extent block is always legal (stores are masked)
    tn = min(H, target_cols)
    tn -= tn % 128
    while H % tn != 0:
        tn -= 128
    return tn


def embeddings_forward(x, w, b, pos, *, target_rows=512, target_cols=512,
                       compute_dtype=None, out_dtype=None):
    """x: (B, L, D_in), w: (D_in, H), b: (H,), pos: (1, L, H) or None -> (B, L, H)."""
    B, L, D_in = x.shape
    H = w.shape[1]
    M = B * L

    cdt = compute_dtype or x.dtype     # bf16 ~halves HBM traffic (mem-bound kernel)
    odt = out_dtype or x.dtype

    # Fold bias into the position embeddings once (parameter-setup cost), kept
    # in f32 since it is added after the f32 MXU accumulate.
    if pos is not None:
        pos_b = (pos.reshape(L, H) + b.reshape(1, H)).astype(jnp.float32)
    else:
        pos_b = jnp.broadcast_to(b.reshape(1, H).astype(jnp.float32), (L, H))

    tm = _choose_row_tile(B, L, target_rows)
    tn = _choose_col_tile(H, target_cols)
    bt = tm // L
    grid_m, grid_n = M // tm, H // tn

    # If L is not sublane-aligned, pre-tile pos once here so the kernel's add is
    # a plain element-wise add (no per-step tiling/copies inside the grid loop).
    if bt > 1 and L % 8 != 0:
        pos_b = jnp.tile(pos_b, (bt, 1))
    pos_rows = pos_b.shape[0]

    # Flatten (B, L) -> M rows (contiguous reshape: no data movement).
    x2 = x.reshape(M, D_in).astype(cdt)
    w2 = w.astype(cdt)

    resident = grid_n == 1            # weight/pos blocks constant over the grid
    cbytes = jnp.dtype(cdt).itemsize
    obytes = jnp.dtype(odt).itemsize
    wbuf = 1 if resident else 2
    vmem_need = (2 * tm * D_in * cbytes        # x tile, double-buffered
                 + 2 * tm * tn * obytes        # out tile, double-buffered
                 + wbuf * D_in * tn * cbytes   # weight tile
                 + wbuf * pos_rows * tn * 4)   # pos+bias tile (f32)
    vmem_limit = int(min(max(vmem_need + (8 << 20), 32 << 20), 64 << 20))

    cost = pl.CostEstimate(
        flops=2 * M * D_in * H,
        transcendentals=0,
        bytes_accessed=int(x2.size * cbytes + w2.size * cbytes
                           + pos_b.size * 4 + M * H * obytes),
    )

    def _call(single_buffer_resident):
        def const_spec(shape, index_map):
            if single_buffer_resident:
                return pl.BlockSpec(shape, index_map,
                                    pipeline_mode=pl.Buffered(1))
            return pl.BlockSpec(shape, index_map)

        return pl.pallas_call(
            embeddings_kernel,
            out_shape=jax.ShapeDtypeStruct((M, H), odt),
            grid_spec=pltpu.PrefetchScalarGridSpec(
                num_scalar_prefetch=0,
                grid=(grid_m, grid_n),
                in_specs=[
                    pl.BlockSpec((tm, D_in), lambda i, j: (i, 0)),      # x rows
                    const_spec((D_in, tn), lambda i, j: (0, j)),        # weight
                    const_spec((pos_rows, tn), lambda i, j: (0, j)),    # pos+bias
                ],
                out_specs=pl.BlockSpec((tm, tn), lambda i, j: (i, j)),
            ),
            compiler_params=pltpu.CompilerParams(
                dimension_semantics=("parallel", "parallel"),
                vmem_limit_bytes=vmem_limit,
            ),
            cost_estimate=cost,
        )(x2, w2, pos_b)

    if resident and hasattr(pl, "Buffered"):
        try:
            out = _call(True)     # single-buffer the grid-constant blocks
        except Exception:         # older toolchains: fall back to default buffering
            out = _call(False)
    else:
        out = _call(False)

    return out.reshape(B, L, H)


if __name__ == "__main__":
    # Small config consistent with the module:
    #   input_dim=16, hidden_size=32, input_length=8, position_embeddings=True
    B, L, D_in, H = 2, 8, 16, 32

    key = jax.random.PRNGKey(0)
    kx, kw, kb, kp = jax.random.split(key, 4)

    x = jax.random.normal(kx, (B, L, D_in), dtype=jnp.float32)
    # Deterministic parameters (shapes match nn.Linear(D_in, H) and the
    # (1, L, H) position-embedding Parameter). Values are synthetic.
    w = jax.random.normal(kw, (D_in, H), dtype=jnp.float32) * 0.05
    b = jax.random.normal(kb, (H,), dtype=jnp.float32) * 0.05
    pos = jax.random.normal(kp, (1, L, H), dtype=jnp.float32) * 0.02

    ref = jnp.einsum("bld,dh->blh", x, w) + b.reshape(1, 1, H) + pos

    # Default f32 path: matches the PyTorch module's numerics exactly.
    out = jax.block_until_ready(embeddings_forward(x, w, b, pos))
    assert out.shape == (B, L, H)
    assert jnp.allclose(out, ref, atol=1e-5, rtol=1e-5)

    # bf16 compute/out path (HBM-bandwidth optimization); looser tolerance.
    out_bf16 = jax.block_until_ready(
        embeddings_forward(x, w, b, pos,
                           compute_dtype=jnp.bfloat16, out_dtype=jnp.bfloat16))
    assert jnp.allclose(out_bf16.astype(jnp.float32), ref, atol=3e-2, rtol=3e-2)

    print("KERNEL_OK")
</pallas_src>

<mosaic_0001>
module attributes {stable_mosaic.version = 11 : i64} {
  func.func @embeddings_kernel(%arg0: i32, %arg1: i32, %arg2: memref<8x16xf32, #tpu.memory_space<vmem>>, %arg3: memref<16x32xf32, #tpu.memory_space<vmem>>, %arg4: memref<8x32xf32, #tpu.memory_space<vmem>>, %arg5: memref<8x32xf32, #tpu.memory_space<vmem>>) attributes {dimension_semantics = [#tpu.dimension_semantics<parallel>, #tpu.dimension_semantics<parallel>], iteration_bounds = array<i64: 2, 1>, scalar_prefetch = 0 : i64, scratch_operands = 0 : i64, tpu.core_type = #tpu.core_type<tc>, window_params = [{transform_indices = @transform_0, window_bounds = array<i64: 8, 16>}, {pipeline_mode = #tpu.pipeline_mode<synchronous>, transform_indices = @transform_1, window_bounds = array<i64: 16, 32>}, {pipeline_mode = #tpu.pipeline_mode<synchronous>, transform_indices = @transform_2, window_bounds = array<i64: 8, 32>}, {transform_indices = @transform_3, window_bounds = array<i64: 8, 32>}]} {
    %c0 = arith.constant 0 : index
    %c0_0 = arith.constant 0 : index
    %0 = vector.load %arg2[%c0, %c0_0] : memref<8x16xf32, #tpu.memory_space<vmem>>, vector<8x16xf32>
    %c0_1 = arith.constant 0 : index
    %c0_2 = arith.constant 0 : index
    %1 = vector.load %arg3[%c0_1, %c0_2] : memref<16x32xf32, #tpu.memory_space<vmem>>, vector<16x32xf32>
    %cst = arith.constant dense<0.000000e+00> : vector<8x32xf32>
    %2 = tpu.matmul %0, %1, %cst {dimension_numbers = #tpu.dot_dimension_numbers<[1], [0], [0], [1], [0, 0, 1, 1], [], []>} : vector<8x16xf32>, vector<16x32xf32>, vector<8x32xf32> -> vector<8x32xf32>
    %c0_3 = arith.constant 0 : index
    %c0_4 = arith.constant 0 : index
    %3 = vector.load %arg4[%c0_3, %c0_4] : memref<8x32xf32, #tpu.memory_space<vmem>>, vector<8x32xf32>
    %4 = arith.addf %2, %3 : vector<8x32xf32>
    %c0_5 = arith.constant 0 : index
    %c0_6 = arith.constant 0 : index
    %5 = vector.load %arg5[%c0_5, %c0_6] : memref<8x32xf32, #tpu.memory_space<vmem>>, vector<8x32xf32>
    tpu.vector_store %arg5[%c0_5, %c0_6], %4 {strides = array<i32>} : memref<8x32xf32, #tpu.memory_space<vmem>>, vector<8x32xf32>,
    return
  }
  func.func @transform_0(%arg0: i32, %arg1: i32) -> (i32, i32) {
    %c0_i32 = arith.constant 0 : i32
    %c0_i32_0 = arith.constant 0 : i32
    return %arg0, %c0_i32 : i32, i32
  }
  func.func @transform_1(%arg0: i32, %arg1: i32) -> (i32, i32) {
    %c0_i32 = arith.constant 0 : i32
    %c0_i32_0 = arith.constant 0 : i32
    return %c0_i32, %arg1 : i32, i32
  }
  func.func @transform_2(%arg0: i32, %arg1: i32) -> (i32, i32) {
    %c0_i32 = arith.constant 0 : i32
    %c0_i32_0 = arith.constant 0 : i32
    return %c0_i32, %arg1 : i32, i32
  }
  func.func @transform_3(%arg0: i32, %arg1: i32) -> (i32, i32) {
    %c0_i32 = arith.constant 0 : i32
    return %arg0, %arg1 : i32, i32
  }
}

module attributes {stable_mosaic.version = 11 : i64} {
  func.func @embeddings_kernel(%arg0: i32, %arg1: i32, %arg2: memref<8x16xf32, #tpu.memory_space<vmem>>, %arg3: memref<16x32xf32, #tpu.memory_space<vmem>>, %arg4: memref<8x32xf32, #tpu.memory_space<vmem>>, %arg5: memref<8x32xf32, #tpu.memory_space<vmem>>) attributes {dimension_semantics = [#tpu.dimension_semantics<parallel>, #tpu.dimension_semantics<parallel>], iteration_bounds = array<i64: 2, 1>, scalar_prefetch = 0 : i64, scratch_operands = 0 : i64, tpu.core_type = #tpu.core_type<tc>, window_params = [{transform_indices = @transform_0, window_bounds = array<i64: 8, 16>}, {transform_indices = @transform_1, window_bounds = array<i64: 16, 32>}, {transform_indices = @transform_2, window_bounds = array<i64: 8, 32>}, {transform_indices = @transform_3, window_bounds = array<i64: 8, 32>}]} {
    %c0 = arith.constant 0 : index
    %c0_0 = arith.constant 0 : index
    %0 = vector.load %arg2[%c0, %c0_0] : memref<8x16xf32, #tpu.memory_space<vmem>>, vector<8x16xf32>
    %c0_1 = arith.constant 0 : index
    %c0_2 = arith.constant 0 : index
    %1 = vector.load %arg3[%c0_1, %c0_2] : memref<16x32xf32, #tpu.memory_space<vmem>>, vector<16x32xf32>
    %cst = arith.constant dense<0.000000e+00> : vector<8x32xf32>
    %2 = tpu.matmul %0, %1, %cst {dimension_numbers = #tpu.dot_dimension_numbers<[1], [0], [0], [1], [0, 0, 1, 1], [], []>} : vector<8x16xf32>, vector<16x32xf32>, vector<8x32xf32> -> vector<8x32xf32>
    %c0_3 = arith.constant 0 : index
    %c0_4 = arith.constant 0 : index
    %3 = vector.load %arg4[%c0_3, %c0_4] : memref<8x32xf32, #tpu.memory_space<vmem>>, vector<8x32xf32>
    %4 = arith.addf %2, %3 : vector<8x32xf32>
    %c0_5 = arith.constant 0 : index
    %c0_6 = arith.constant 0 : index
    %5 = vector.load %arg5[%c0_5, %c0_6] : memref<8x32xf32, #tpu.memory_space<vmem>>, vector<8x32xf32>
    tpu.vector_store %arg5[%c0_5, %c0_6], %4 {strides = array<i32>} : memref<8x32xf32, #tpu.memory_space<vmem>>, vector<8x32xf32>,
    return
  }
  func.func @transform_0(%arg0: i32, %arg1: i32) -> (i32, i32) {
    %c0_i32 = arith.constant 0 : i32
    %c0_i32_0 = arith.constant 0 : i32
    return %arg0, %c0_i32 : i32, i32
  }
  func.func @transform_1(%arg0: i32, %arg1: i32) -> (i32, i32) {
    %c0_i32 = arith.constant 0 : i32
    %c0_i32_0 = arith.constant 0 : i32
    return %c0_i32, %arg1 : i32, i32
  }
  func.func @transform_2(%arg0: i32, %arg1: i32) -> (i32, i32) {
    %c0_i32 = arith.constant 0 : i32
    %c0_i32_0 = arith.constant 0 : i32
    return %c0_i32, %arg1 : i32, i32
  }
  func.func @transform_3(%arg0: i32, %arg1: i32) -> (i32, i32) {
    %c0_i32 = arith.constant 0 : i32
    return %arg0, %arg1 : i32, i32
  }
}

</mosaic_0001>

<bundles_post_ra>
// kernel: tpu_custom_call.1
= control target key start
LH: loop header
LB: loop body
LE: loop exit
PB: predicated region body
PF: predicated region fallthrough
CT: control target
= control target key end

     0   :  { %8 = vsyncpa [#allocation3], 0  ;;  %s1010_s0 = inlined_call_operand.hbm [shape: f32[16,16], index: 0, kind: input, shape index: {}]   ;;  %s1011_s1 = inlined_call_operand.hbm [shape: f32[16,32], index: 1, kind: input, shape index: {}]   ;;  %s1012_s2 = inlined_call_operand.hbm [shape: f32[8,32], index: 2, kind: input, shape index: {}]   ;;  %s1013_s3 = inlined_call_operand.hbm [shape: f32[16,32], index: 3, kind: output, shape index: {}]  }
   0x1   :  { %10 = vsyncpa [#allocation3 + $0x1], 0 }
   0x2   :  { %11 = vsyncpa [#allocation6], 0 }
   0x3   :  { %12 = vsyncpa [#allocation4], 0 }
   0x4   :  { %14 = vsyncpa [#allocation4 + $0x1], 0  ;;  %s760_s12 = smov 0   ;;  %s762_s13 = smov 0  }
   0x5   :  { %s764_s14 = smov 0   ;;  %s766_s15 = smov 0  }
   0x6   :  { %s768_s16 = smov 0   ;;  %s770_s17 = smov 0  }
   0x7 LB: > { %s438_s18 = sadd.s32 4294967295, %s729_s17   ;;  %s439_s19 = sadd.s32 4294967294, %s729_s17   ;;  %s729_s17 = sphi %s770_s17, %s20_s17   ;;  %s725_s16 = sphi %s768_s16, %s1035_s16   ;;  %s721_s15 = sphi %s766_s15, %s1034_s15   ;;  %s717_s14 = sphi %s764_s14, %s1033_s14   ;;  %s713_s13 = sphi %s762_s13, %s1032_s13   ;;  %s709_s12 = sphi %s760_s12, %s1031_s12  }
   0x8   : > { %p52_p0 = scmp.ne.s32.totalorder %s713_s13, %s709_s12  ;;  %p794_p1 = scmp.eq.s32.totalorder %s438_s18, 0 }
   0x9   : > { %p798_p2 = scmp.eq.s32.totalorder %s438_s18, 1  ;;  %p136_p3 = scmp.eq.s32.totalorder %s439_s19, 1 }
   0xa   : > { %s1018_s20 = scalar_select %p794_p1, 1, 0 }
   0xb   : > { %p804_p4 = por %p794_p1, %p52_p0  ;;  %p440_p5 = scmp.ge.s32.totalorder %s729_s17, 1 }
   0xc   : > { %p809_p6 = por %p136_p3, %p52_p0  ;;  %p143_p7 = scmp.lt.s32.totalorder %s729_s17, 3 }
   0xd   : > { %s1020_s22 = scalar_select %p804_p4, 1, 0 }
   0xe   : > { %s1021_s23 = scalar_select %p809_p6, 1, 0 }
   0xf   : > { %p814_p8 = pnand %p440_p5, %p143_p7  ;;  %s731_s25 = smov [#allocation5]  }
  0x10   : > { %s157_s26 = sshll.u32 %s731_s25, 4  ;;  %s732_s28 = smov [#allocation7]   ;;  %s818_s26 = int_to_ptr.vmem [resolvable:$true] %s157_s26 }
  0x11   : > { %p481_p9 = pneg %p814_p8  ;;  %s173_s29 = sshll.u32 %s732_s28, 4  ;;  %s829_s29 = int_to_ptr.vmem [resolvable:$true] %s173_s29 }
  0x12   : > { %s557_s5 = scalar_lea.hbm %s1011_s1, 256 }
  0x13   : > { %p825_p11 = pnand %p481_p9, %p794_p1  ;;  %p558_p12 = scmp.ne.s32.totalorder %s1011_s1, %s557_s5 }
  0x14   : > { %p564_p5 = scmp.lt.u32.totalorder %s557_s5, %s1011_s1 }
  0x15   : > { %p559_p13 = pneg %p825_p11 }
  0x17   : > { %p560_p0 = pnand %p559_p13, %p558_p12 }
  0x19   : > { %p561_p3 = pneg %p560_p0 }
  0x1b   : > { %p566_p7 = pnand %p564_p5, %p561_p3 }
  0x1d   : > { %569 = shalt.err (!%p566_p7)
}
  0x1e   : > { %s570_s10 = scalar_lea.vmem %s818_s26, 256  ;;  %p578_p1 = scmp.lt.s32.totalorder %s818_s26, %s818_s26 }
  0x1f   : > { %p571_p9 = scmp.ne.s32.totalorder %s818_s26, %s570_s10  ;;  %p579_p12 = scmp.lt.s32.totalorder %s570_s10, %s570_s10 }
  0x21   : > { %p573_p10 = pnand %p571_p9, %p559_p13  ;;  %p580_p0 = por %p579_p12, %p578_p1 }
  0x23   : > { %p574_p6 = pneg %p573_p10 }
  0x25   : > { %p581_p4 = pnand %p580_p0, %p574_p6 }
  0x27   : > { %584 = shalt.err (!%p581_p4)
}
  0x28   : > { %s733_s11 = smov 128   ;;  %s734_s18 = smov 8  }
  0x29   : > { %484 = dma.hbm_to_vmem [thread:$0]  (!%p825_p11), %s1011_s1, 256, %s818_s26, [#allocation6], %s733_s11, %s733_s11, %s734_s18  }
  0x2a   : > { %s585_s4 = scalar_lea.hbm %s1012_s2, 128 }
  0x2b   : > { %p586_p1 = scmp.ne.s32.totalorder %s1012_s2, %s585_s4  ;;  %p592_p10 = scmp.lt.u32.totalorder %s585_s4, %s1012_s2 }
  0x2d   : > { %p588_p4 = pnand %p586_p1, %p559_p13 }
  0x2f   : > { %p589_p6 = pneg %p588_p4 }
  0x31   : > { %p594_p3 = pnand %p592_p10, %p589_p6 }
  0x33   : > { %597 = shalt.err (!%p594_p3)
}
  0x34   : > { %s598_s26 = scalar_lea.vmem %s829_s29, 128  ;;  %p606_p12 = scmp.lt.s32.totalorder %s829_s29, %s829_s29 }
  0x35   : > { %p599_p5 = scmp.ne.s32.totalorder %s829_s29, %s598_s26  ;;  %p607_p0 = scmp.lt.s32.totalorder %s598_s26, %s598_s26 }
  0x37   : > { %p601_p7 = pnand %p599_p5, %p559_p13  ;;  %p608_p1 = por %p607_p0, %p606_p12 }
  0x39   : > { %p602_p9 = pneg %p601_p7 }
  0x3b   : > { %p609_p4 = pnand %p608_p1, %p602_p9 }
  0x3d   : > { %612 = shalt.err (!%p609_p4)
}
  0x3e   : > { %487 = dma.hbm_to_vmem [thread:$0]  (!%p825_p11), %s1012_s2, 128, %s829_s29, [#allocation6]  }
  0x3f   : > { %s32_s11 = sadd.s32 1, %s725_s16  ;;  %s39_s18 = sadd.s32 1, %s717_s14 }
  0x40   : > { %p34_p13 = scmp.ge.s32.totalorder %s32_s11, 2  ;;  %p46_p6 = scmp.ne.s32.totalorder %s717_s14, %s713_s13 }
  0x41   : > { %p47_p10 = scmp.eq.s32.totalorder %s729_s17, 0  ;;  %p498_p3 = scmp.lt.s32.totalorder %s729_s17, 2 }
  0x42   : > { %s1037_s11 = smov (%p34_p13, %s32_s11), 0  ;;  %p893_p7 = por %p798_p2, %p46_p6 }
  0x43   : > { %p48_p5 = por %p47_p10, %p46_p6  ;;  %s36_s19 = ssub.s32 %s725_s16, %s1037_s11 }
  0x44   : > { %s1024_s27 = scalar_select %p893_p7, 1, 0 }
  0x45   : > { %s184_s25 = sand.u32 1, %s717_s14   ;;  %p37_p9 = scmp.eq.s32.totalorder %s36_s19, 0 }
  0x46   : > { %s444_s29 = sshll.u32 %s184_s25, 3  ;;  %s445_s28 = sshll.u32 %s725_s16, 7 }
  0x47   : > { %s902_s30 = scalar_select %p37_p9, %s717_s14, %s39_s18  }
  0x48   : > { %s907_s6 = scalar_lea.hbm %s1010_s0, %s445_s28  ;;  %s188_s21 = scalar_lea.vmem [#allocation2], %s444_s29 }
  0x49   : > { %s195_s7 = sshll.u32 %s188_s21, 4  ;;  %p911_p2 = pnand %p498_p3, %p48_p5  ;;  %s915_s7 = int_to_ptr.vmem [resolvable:$true] %s195_s7 }
  0x4a   : > { %s185_s26 = scalar_lea.sflag [#allocation3], %s184_s25  ;;  %s613_s9 = scalar_lea.hbm %s907_s6, 128 }
  0x4b   : > { %p614_p11 = scmp.ne.s32.totalorder %s907_s6, %s613_s9  ;;  %p615_p12 = pneg %p911_p2 }
  0x4c   : > { %s618_s19 = scalar_lea.hbm %s1010_s0, 256  ;;  %p619_p4 = scmp.lt.u32.totalorder %s907_s6, %s1010_s0 }
  0x4d   : > { %p616_p0 = pnand %p615_p12, %p614_p11  ;;  %p620_p13 = scmp.lt.u32.totalorder %s618_s19, %s613_s9 }
  0x4e   : > { %p622_p10 = scmp.lt.u32.totalorder %s613_s9, %s907_s6 }
  0x4f   : > { %p617_p1 = pneg %p616_p0  ;;  %p621_p6 = por %p620_p13, %p619_p4 }
  0x51   : > { %p623_p3 = por %p622_p10, %p621_p6 }
  0x53   : > { %p624_p5 = pnand %p623_p3, %p617_p1 }
  0x55   : > { %627 = shalt.err (!%p624_p5)
}
  0x56   : > { %s628_s25 = scalar_lea.vmem %s915_s7, 128  ;;  %s735_s4 = smov [#allocation2]  }
  0x57   : > { %p629_p9 = scmp.ne.s32.totalorder %s915_s7, %s628_s25  ;;  %s633_s5 = sshll.u32 %s735_s4, 4  ;;  %s634_s5 = int_to_ptr.vmem [resolvable:$false] %s633_s5 }
  0x58   : > { %s635_s21 = scalar_lea.vmem %s634_s5, 256  ;;  %p636_p7 = scmp.lt.s32.totalorder %s915_s7, %s634_s5 }
  0x59   : > { %p631_p11 = pnand %p629_p9, %p615_p12  ;;  %p637_p4 = scmp.lt.s32.totalorder %s635_s21, %s628_s25 }
  0x5b   : > { %p632_p0 = pneg %p631_p11  ;;  %p638_p13 = por %p637_p4, %p636_p7 }
  0x5d   : > { %p639_p6 = pnand %p638_p13, %p632_p0 }
  0x5f   : > { %642 = shalt.err (!%p639_p6)
}
  0x60   : > { %491 = dma.hbm_to_vmem [thread:$0]  (!%p911_p2), %s907_s6, 128, %s915_s7, %s185_s26  }
  0x61   : > { %204 = sbr.rel (%p814_p8) target bundleno = 343 (0x157), region = 32  ;;  %s945_s9 = sand.u32 (!%p814_p8), 1, %s713_s13  }
  0x62   : > { %s447_s10 = sshll.u32 (!%p814_p8), %s945_s9, 3  ;;  %s207_s18 = scalar_lea.sflag (!%p814_p8), [#allocation3], %s945_s9 }
  0x63   : > { %s210_s19 = scalar_lea.vmem (!%p814_p8), [#allocation2], %s447_s10  ;;  %p1026_p7 = scmp.ne.s32.totalorder (!%p814_p8), %s1020_s22, 0 }
  0x68   : > { %696 = dma.done.wait (%p1026_p7), %s207_s18, 128  }
  0x69   : > { %698 = vsyncadd (%p1026_p7), %s207_s18, 4294967168  ;;  %p1027_p12 = scmp.ne.s32.totalorder %s1018_s20, 0 }
  0x6b   : > { %700 = dma.done.wait (%p1027_p12), [#allocation6], 384  }
  0x6c   : > { %702 = vsyncadd (%p1027_p12), [#allocation6], 4294966912  ;;  %v736_v0 = vmov 0.0|0.0   ;;  %vm737_vm0 = vmmov 0   ;;  %v738_v1 = vmov 0.0   ;;  %v242_v2 = vld [vmem:[#allocation5] sm:$0xff] }
  0x6d   : > { %466 = vmatprep.subr.bf16.mxu0 %v736_v0  ;;  %463 = vmatprep.mubr.msk.f32.mxu0 %vm737_vm0, %v738_v1  ;;  %v243_v3 = vld [vmem:[#allocation5 + $0x8] sm:$0xff]  ;;  %v241_v5 = vld [vmem:[%s210_s19] sm:$0xff]  ;;  %vm245_vm1 = vcmask 130048   ;;  %s453_s22 = sshll.u32 %s721_s15, 7  ;;  %s240_s24 = scalar_lea.vmem [#allocation8], %s447_s10  ;;  %vm319_vm2 = vcmask 261120  }
  0x6e   : > { %v467_v4 = vpack.c.bf16 %v243_v3, %v242_v2  ;;  %v244_v6 = vld [vmem:[#allocation7] sm:$0xff]  ;;  %s336_s20 = sshll.u32 %s240_s24, 4  ;;  %s961_s8 = scalar_lea.hbm %s1013_s3, %s453_s22  ;;  %s963_s20 = int_to_ptr.vmem [resolvable:$true] %s336_s20 }
  0x6f   : > { %s322_s26 = scalar_lea.sflag [#allocation4], %s945_s9  ;;  %s643_s29 = scalar_lea.vmem %s963_s20, 128 }
  0x70   : > { %468 = vmatpush3.bf16.msra.mxu0 %v467_v4  ;;  %p644_p8 = scmp.ne.s32.totalorder %s963_s20, %s643_s29  ;;  %p1028_p2 = scmp.ne.s32.totalorder %s1024_s27, 0 }
  0x71   : > { %s739_s15 = smov [#allocation8]  }
  0x72   : > { %p645_p1 = pnand %p644_p8, %p1028_p2  ;;  %s647_s28 = sshll.u32 %s739_s15, 4  ;;  %s648_s28 = int_to_ptr.vmem [resolvable:$false] %s647_s28 }
  0x73   : > { %464 = vmatmul.mubr.msk.f32.vlgmr.msra.gmra.mrb[0].mxu0 %vm245_vm1, %v241_v5  ;;  %s649_s25 = scalar_lea.vmem %s648_s28, 256  ;;  %p650_p3 = scmp.lt.s32.totalorder %s963_s20, %s648_s28 }
  0x74   : > { %p646_p10 = pneg %p645_p1  ;;  %p651_p5 = scmp.lt.s32.totalorder %s649_s25, %s643_s29 }
  0x76   : > { %p652_p9 = por %p651_p5, %p650_p3 }
  0x78   : > { %p653_p11 = pnand %p652_p9, %p646_p10 }
 0x146   : > { %v315_v7 = vpop.f32.mrb[0].mxu0 }
 0x147   : > { %v316_v8 = vadd.f32 %v315_v7, %v244_v6  ;;  %v465_v9 = vpop.f32.mrb[1].mxu0 }
 0x149   : > { %320 = vst.msk [vmem:[%s240_s24] sm:$0xff] %vm319_vm2, %v316_v8 }
 0x14a   : > { %656 = shalt.err (!%p653_p11)
}
 0x14b   : > { %s657_s4 = scalar_lea.hbm %s961_s8, 128  ;;  %s661_s9 = scalar_lea.hbm %s1013_s3, 256 }
 0x14c   : > { %p658_p0 = scmp.ne.s32.totalorder %s961_s8, %s657_s4  ;;  %p662_p6 = scmp.lt.u32.totalorder %s961_s8, %s1013_s3 }
 0x14d   : > { %p663_p7 = scmp.lt.u32.totalorder %s661_s9, %s657_s4  ;;  %p665_p8 = scmp.lt.u32.totalorder %s657_s4, %s961_s8 }
 0x14e   : > { %p659_p4 = pnand %p658_p0, %p1028_p2 }
 0x14f   : > { %p664_p12 = por %p663_p7, %p662_p6 }
 0x150   : > { %p660_p13 = pneg %p659_p4 }
 0x151   : > { %p666_p1 = por %p665_p8, %p664_p12 }
 0x153   : > { %p667_p10 = pnand %p666_p1, %p660_p13 }
 0x155   : > { %670 = shalt.err (!%p667_p10)
}
 0x156   : > { %479 = dma.vmem_to_hbm [thread:$0]  (%p1028_p2), %s963_s20, 128, %s961_s8, %s322_s26  }
 0x157 PF: > { %s348_s19 = sand.u32 1, %s709_s12   ;;  %p1029_p3 = scmp.ne.s32.totalorder %s1021_s23, 0 }
 0x158   : > { %p1030_p5 = scmp.ge.s32.totalorder %s729_s17, 2  ;;  %s349_s22 = scalar_lea.sflag [#allocation4], %s348_s19 }
 0x15a   : > { %p493_p9 = pnand %p1030_p5, %p1029_p3 }
 0x15c   : > { %704 = dma.done.wait (!%p493_p9), %s349_s22, 128  }
 0x15d   : > { %706 = vsyncadd (!%p493_p9), %s349_s22, 4294967168  ;;  %s20_s17 = sadd.s32 1, %s729_s17   ;;  %s1031_s12 = smov %s713_s13 }
 0x15e   : > { %p17_p11 = scmp.ge.s32.totalorder %s20_s17, 4   ;;  %s1032_s13 = smov %s717_s14 }
 0x15f   : > { %s1033_s14 = smov %s902_s30  ;;  %s1034_s15 = smov %s725_s16 }
 0x160   : > { %s1035_s16 = smov %s1037_s11  ;;  %19 = sbr.rel (!%p17_p11) target bundleno = 7 (0x7), region = 87 }
 0x167   :  { %354 = vsyncpa [#allocation3], 1 }
 0x168   :  { %356 = vsyncpa [#allocation3 + $0x1], 1 }
 0x169   :  { %357 = vsyncpa [#allocation6], 1 }
 0x16a   :  { %358 = vsyncpa [#allocation4], 1 }
 0x16b   :  { %360 = vsyncpa [#allocation4 + $0x1], 1 }

// kernel: tpu_custom_call.1
= control target key start
LH: loop header
LB: loop body
LE: loop exit
PB: predicated region body
PF: predicated region fallthrough
CT: control target
= control target key end

     0   :  { %8 = vsyncpa [#allocation3], 0  ;;  %s1010_s0 = inlined_call_operand.hbm [shape: f32[16,16], index: 0, kind: input, shape index: {}]   ;;  %s1011_s1 = inlined_call_operand.hbm [shape: f32[16,32], index: 1, kind: input, shape index: {}]   ;;  %s1012_s2 = inlined_call_operand.hbm [shape: f32[8,32], index: 2, kind: input, shape index: {}]   ;;  %s1013_s3 = inlined_call_operand.hbm [shape: f32[16,32], index: 3, kind: output, shape index: {}]  }
   0x1   :  { %10 = vsyncpa [#allocation3 + $0x1], 0 }
   0x2   :  { %11 = vsyncpa [#allocation6], 0 }
   0x3   :  { %12 = vsyncpa [#allocation4], 0 }
   0x4   :  { %14 = vsyncpa [#allocation4 + $0x1], 0  ;;  %s760_s12 = smov 0   ;;  %s762_s13 = smov 0  }
   0x5   :  { %s764_s14 = smov 0   ;;  %s766_s15 = smov 0  }
   0x6   :  { %s768_s16 = smov 0   ;;  %s770_s17 = smov 0  }
   0x7 LB: > { %s438_s18 = sadd.s32 4294967295, %s729_s17   ;;  %s439_s19 = sadd.s32 4294967294, %s729_s17   ;;  %s729_s17 = sphi %s770_s17, %s20_s17   ;;  %s725_s16 = sphi %s768_s16, %s1035_s16   ;;  %s721_s15 = sphi %s766_s15, %s1034_s15   ;;  %s717_s14 = sphi %s764_s14, %s1033_s14   ;;  %s713_s13 = sphi %s762_s13, %s1032_s13   ;;  %s709_s12 = sphi %s760_s12, %s1031_s12  }
   0x8   : > { %p52_p0 = scmp.ne.s32.totalorder %s713_s13, %s709_s12  ;;  %p794_p1 = scmp.eq.s32.totalorder %s438_s18, 0 }
   0x9   : > { %p798_p2 = scmp.eq.s32.totalorder %s438_s18, 1  ;;  %p136_p3 = scmp.eq.s32.totalorder %s439_s19, 1 }
   0xa   : > { %s1018_s20 = scalar_select %p794_p1, 1, 0 }
   0xb   : > { %p804_p4 = por %p794_p1, %p52_p0  ;;  %p440_p5 = scmp.ge.s32.totalorder %s729_s17, 1 }
   0xc   : > { %p809_p6 = por %p136_p3, %p52_p0  ;;  %p143_p7 = scmp.lt.s32.totalorder %s729_s17, 3 }
   0xd   : > { %s1020_s22 = scalar_select %p804_p4, 1, 0 }
   0xe   : > { %s1021_s23 = scalar_select %p809_p6, 1, 0 }
   0xf   : > { %p814_p8 = pnand %p440_p5, %p143_p7  ;;  %s731_s25 = smov [#allocation5]  }
  0x10   : > { %s157_s26 = sshll.u32 %s731_s25, 4  ;;  %s732_s28 = smov [#allocation7]   ;;  %s818_s26 = int_to_ptr.vmem [resolvable:$true] %s157_s26 }
  0x11   : > { %p481_p9 = pneg %p814_p8  ;;  %s173_s29 = sshll.u32 %s732_s28, 4  ;;  %s829_s29 = int_to_ptr.vmem [resolvable:$true] %s173_s29 }
  0x12   : > { %s557_s5 = scalar_lea.hbm %s1011_s1, 256 }
  0x13   : > { %p825_p11 = pnand %p481_p9, %p794_p1  ;;  %p558_p12 = scmp.ne.s32.totalorder %s1011_s1, %s557_s5 }
  0x14   : > { %p564_p5 = scmp.lt.u32.totalorder %s557_s5, %s1011_s1 }
  0x15   : > { %p559_p13 = pneg %p825_p11 }
  0x17   : > { %p560_p0 = pnand %p559_p13, %p558_p12 }
  0x19   : > { %p561_p3 = pneg %p560_p0 }
  0x1b   : > { %p566_p7 = pnand %p564_p5, %p561_p3 }
  0x1d   : > { %569 = shalt.err (!%p566_p7)
}
  0x1e   : > { %s570_s10 = scalar_lea.vmem %s818_s26, 256  ;;  %p578_p1 = scmp.lt.s32.totalorder %s818_s26, %s818_s26 }
  0x1f   : > { %p571_p9 = scmp.ne.s32.totalorder %s818_s26, %s570_s10  ;;  %p579_p12 = scmp.lt.s32.totalorder %s570_s10, %s570_s10 }
  0x21   : > { %p573_p10 = pnand %p571_p9, %p559_p13  ;;  %p580_p0 = por %p579_p12, %p578_p1 }
  0x23   : > { %p574_p6 = pneg %p573_p10 }
  0x25   : > { %p581_p4 = pnand %p580_p0, %p574_p6 }
  0x27   : > { %584 = shalt.err (!%p581_p4)
}
  0x28   : > { %s733_s11 = smov 128   ;;  %s734_s18 = smov 8  }
  0x29   : > { %484 = dma.hbm_to_vmem [thread:$0]  (!%p825_p11), %s1011_s1, 256, %s818_s26, [#allocation6], %s733_s11, %s733_s11, %s734_s18  }
  0x2a   : > { %s585_s4 = scalar_lea.hbm %s1012_s2, 128 }
  0x2b   : > { %p586_p1 = scmp.ne.s32.totalorder %s1012_s2, %s585_s4  ;;  %p592_p10 = scmp.lt.u32.totalorder %s585_s4, %s1012_s2 }
  0x2d   : > { %p588_p4 = pnand %p586_p1, %p559_p13 }
  0x2f   : > { %p589_p6 = pneg %p588_p4 }
  0x31   : > { %p594_p3 = pnand %p592_p10, %p589_p6 }
  0x33   : > { %597 = shalt.err (!%p594_p3)
}
  0x34   : > { %s598_s26 = scalar_lea.vmem %s829_s29, 128  ;;  %p606_p12 = scmp.lt.s32.totalorder %s829_s29, %s829_s29 }
  0x35   : > { %p599_p5 = scmp.ne.s32.totalorder %s829_s29, %s598_s26  ;;  %p607_p0 = scmp.lt.s32.totalorder %s598_s26, %s598_s26 }
  0x37   : > { %p601_p7 = pnand %p599_p5, %p559_p13  ;;  %p608_p1 = por %p607_p0, %p606_p12 }
  0x39   : > { %p602_p9 = pneg %p601_p7 }
  0x3b   : > { %p609_p4 = pnand %p608_p1, %p602_p9 }
  0x3d   : > { %612 = shalt.err (!%p609_p4)
}
  0x3e   : > { %487 = dma.hbm_to_vmem [thread:$0]  (!%p825_p11), %s1012_s2, 128, %s829_s29, [#allocation6]  }
  0x3f   : > { %s32_s11 = sadd.s32 1, %s725_s16  ;;  %s39_s18 = sadd.s32 1, %s717_s14 }
  0x40   : > { %p34_p13 = scmp.ge.s32.totalorder %s32_s11, 2  ;;  %p46_p6 = scmp.ne.s32.totalorder %s717_s14, %s713_s13 }
  0x41   : > { %p47_p10 = scmp.eq.s32.totalorder %s729_s17, 0  ;;  %p498_p3 = scmp.lt.s32.totalorder %s729_s17, 2 }
  0x42   : > { %s1037_s11 = smov (%p34_p13, %s32_s11), 0  ;;  %p893_p7 = por %p798_p2, %p46_p6 }
  0x43   : > { %p48_p5 = por %p47_p10, %p46_p6  ;;  %s36_s19 = ssub.s32 %s725_s16, %s1037_s11 }
  0x44   : > { %s1024_s27 = scalar_select %p893_p7, 1, 0 }
  0x45   : > { %s184_s25 = sand.u32 1, %s717_s14   ;;  %p37_p9 = scmp.eq.s32.totalorder %s36_s19, 0 }
  0x46   : > { %s444_s29 = sshll.u32 %s184_s25, 3  ;;  %s445_s28 = sshll.u32 %s725_s16, 7 }
  0x47   : > { %s902_s30 = scalar_select %p37_p9, %s717_s14, %s39_s18  }
  0x48   : > { %s907_s6 = scalar_lea.hbm %s1010_s0, %s445_s28  ;;  %s188_s21 = scalar_lea.vmem [#allocation2], %s444_s29 }
  0x49   : > { %s195_s7 = sshll.u32 %s188_s21, 4  ;;  %p911_p2 = pnand %p498_p3, %p48_p5  ;;  %s915_s7 = int_to_ptr.vmem [resolvable:$true] %s195_s7 }
  0x4a   : > { %s185_s26 = scalar_lea.sflag [#allocation3], %s184_s25  ;;  %s613_s9 = scalar_lea.hbm %s907_s6, 128 }
  0x4b   : > { %p614_p11 = scmp.ne.s32.totalorder %s907_s6, %s613_s9  ;;  %p615_p12 = pneg %p911_p2 }
  0x4c   : > { %s618_s19 = scalar_lea.hbm %s1010_s0, 256  ;;  %p619_p4 = scmp.lt.u32.totalorder %s907_s6, %s1010_s0 }
  0x4d   : > { %p616_p0 = pnand %p615_p12, %p614_p11  ;;  %p620_p13 = scmp.lt.u32.totalorder %s618_s19, %s613_s9 }
  0x4e   : > { %p622_p10 = scmp.lt.u32.totalorder %s613_s9, %s907_s6 }
  0x4f   : > { %p617_p1 = pneg %p616_p0  ;;  %p621_p6 = por %p620_p13, %p619_p4 }
  0x51   : > { %p623_p3 = por %p622_p10, %p621_p6 }
  0x53   : > { %p624_p5 = pnand %p623_p3, %p617_p1 }
  0x55   : > { %627 = shalt.err (!%p624_p5)
}
  0x56   : > { %s628_s25 = scalar_lea.vmem %s915_s7, 128  ;;  %s735_s4 = smov [#allocation2]  }
  0x57   : > { %p629_p9 = scmp.ne.s32.totalorder %s915_s7, %s628_s25  ;;  %s633_s5 = sshll.u32 %s735_s4, 4  ;;  %s634_s5 = int_to_ptr.vmem [resolvable:$false] %s633_s5 }
  0x58   : > { %s635_s21 = scalar_lea.vmem %s634_s5, 256  ;;  %p636_p7 = scmp.lt.s32.totalorder %s915_s7, %s634_s5 }
  0x59   : > { %p631_p11 = pnand %p629_p9, %p615_p12  ;;  %p637_p4 = scmp.lt.s32.totalorder %s635_s21, %s628_s25 }
  0x5b   : > { %p632_p0 = pneg %p631_p11  ;;  %p638_p13 = por %p637_p4, %p636_p7 }
  0x5d   : > { %p639_p6 = pnand %p638_p13, %p632_p0 }
  0x5f   : > { %642 = shalt.err (!%p639_p6)
}
  0x60   : > { %491 = dma.hbm_to_vmem [thread:$0]  (!%p911_p2), %s907_s6, 128, %s915_s7, %s185_s26  }
  0x61   : > { %204 = sbr.rel (%p814_p8) target bundleno = 343 (0x157), region = 32  ;;  %s945_s9 = sand.u32 (!%p814_p8), 1, %s713_s13  }
  0x62   : > { %s447_s10 = sshll.u32 (!%p814_p8), %s945_s9, 3  ;;  %s207_s18 = scalar_lea.sflag (!%p814_p8), [#allocation3], %s945_s9 }
  0x63   : > { %s210_s19 = scalar_lea.vmem (!%p814_p8), [#allocation2], %s447_s10  ;;  %p1026_p7 = scmp.ne.s32.totalorder (!%p814_p8), %s1020_s22, 0 }
  0x68   : > { %696 = dma.done.wait (%p1026_p7), %s207_s18, 128  }
  0x69   : > { %698 = vsyncadd (%p1026_p7), %s207_s18, 4294967168  ;;  %p1027_p12 = scmp.ne.s32.totalorder %s1018_s20, 0 }
  0x6b   : > { %700 = dma.done.wait (%p1027_p12), [#allocation6], 384  }
  0x6c   : > { %702 = vsyncadd (%p1027_p12), [#allocation6], 4294966912  ;;  %v736_v0 = vmov 0.0|0.0   ;;  %vm737_vm0 = vmmov 0   ;;  %v738_v1 = vmov 0.0   ;;  %v242_v2 = vld [vmem:[#allocation5] sm:$0xff] }
  0x6d   : > { %466 = vmatprep.subr.bf16.mxu0 %v736_v0  ;;  %463 = vmatprep.mubr.msk.f32.mxu0 %vm737_vm0, %v738_v1  ;;  %v243_v3 = vld [vmem:[#allocation5 + $0x8] sm:$0xff]  ;;  %v241_v5 = vld [vmem:[%s210_s19] sm:$0xff]  ;;  %vm245_vm1 = vcmask 130048   ;;  %s453_s22 = sshll.u32 %s721_s15, 7  ;;  %s240_s24 = scalar_lea.vmem [#allocation8], %s447_s10  ;;  %vm319_vm2 = vcmask 261120  }
  0x6e   : > { %v467_v4 = vpack.c.bf16 %v243_v3, %v242_v2  ;;  %v244_v6 = vld [vmem:[#allocation7] sm:$0xff]  ;;  %s336_s20 = sshll.u32 %s240_s24, 4  ;;  %s961_s8 = scalar_lea.hbm %s1013_s3, %s453_s22  ;;  %s963_s20 = int_to_ptr.vmem [resolvable:$true] %s336_s20 }
  0x6f   : > { %s322_s26 = scalar_lea.sflag [#allocation4], %s945_s9  ;;  %s643_s29 = scalar_lea.vmem %s963_s20, 128 }
  0x70   : > { %468 = vmatpush3.bf16.msra.mxu0 %v467_v4  ;;  %p644_p8 = scmp.ne.s32.totalorder %s963_s20, %s643_s29  ;;  %p1028_p2 = scmp.ne.s32.totalorder %s1024_s27, 0 }
  0x71   : > { %s739_s15 = smov [#allocation8]  }
  0x72   : > { %p645_p1 = pnand %p644_p8, %p1028_p2  ;;  %s647_s28 = sshll.u32 %s739_s15, 4  ;;  %s648_s28 = int_to_ptr.vmem [resolvable:$false] %s647_s28 }
  0x73   : > { %464 = vmatmul.mubr.msk.f32.vlgmr.msra.gmra.mrb[0].mxu0 %vm245_vm1, %v241_v5  ;;  %s649_s25 = scalar_lea.vmem %s648_s28, 256  ;;  %p650_p3 = scmp.lt.s32.totalorder %s963_s20, %s648_s28 }
  0x74   : > { %p646_p10 = pneg %p645_p1  ;;  %p651_p5 = scmp.lt.s32.totalorder %s649_s25, %s643_s29 }
  0x76   : > { %p652_p9 = por %p651_p5, %p650_p3 }
  0x78   : > { %p653_p11 = pnand %p652_p9, %p646_p10 }
 0x146   : > { %v315_v7 = vpop.f32.mrb[0].mxu0 }
 0x147   : > { %v316_v8 = vadd.f32 %v315_v7, %v244_v6  ;;  %v465_v9 = vpop.f32.mrb[1].mxu0 }
 0x149   : > { %320 = vst.msk [vmem:[%s240_s24] sm:$0xff] %vm319_vm2, %v316_v8 }
 0x14a   : > { %656 = shalt.err (!%p653_p11)
}
 0x14b   : > { %s657_s4 = scalar_lea.hbm %s961_s8, 128  ;;  %s661_s9 = scalar_lea.hbm %s1013_s3, 256 }
 0x14c   : > { %p658_p0 = scmp.ne.s32.totalorder %s961_s8, %s657_s4  ;;  %p662_p6 = scmp.lt.u32.totalorder %s961_s8, %s1013_s3 }
 0x14d   : > { %p663_p7 = scmp.lt.u32.totalorder %s661_s9, %s657_s4  ;;  %p665_p8 = scmp.lt.u32.totalorder %s657_s4, %s961_s8 }
 0x14e   : > { %p659_p4 = pnand %p658_p0, %p1028_p2 }
 0x14f   : > { %p664_p12 = por %p663_p7, %p662_p6 }
 0x150   : > { %p660_p13 = pneg %p659_p4 }
 0x151   : > { %p666_p1 = por %p665_p8, %p664_p12 }
 0x153   : > { %p667_p10 = pnand %p666_p1, %p660_p13 }
 0x155   : > { %670 = shalt.err (!%p667_p10)
}
 0x156   : > { %479 = dma.vmem_to_hbm [thread:$0]  (%p1028_p2), %s963_s20, 128, %s961_s8, %s322_s26  }
 0x157 PF: > { %s348_s19 = sand.u32 1, %s709_s12   ;;  %p1029_p3 = scmp.ne.s32.totalorder %s1021_s23, 0 }
 0x158   : > { %p1030_p5 = scmp.ge.s32.totalorder %s729_s17, 2  ;;  %s349_s22 = scalar_lea.sflag [#allocation4], %s348_s19 }
 0x15a   : > { %p493_p9 = pnand %p1030_p5, %p1029_p3 }
 0x15c   : > { %704 = dma.done.wait (!%p493_p9), %s349_s22, 128  }
 0x15d   : > { %706 = vsyncadd (!%p493_p9), %s349_s22, 4294967168  ;;  %s20_s17 = sadd.s32 1, %s729_s17   ;;  %s1031_s12 = smov %s713_s13 }
 0x15e   : > { %p17_p11 = scmp.ge.s32.totalorder %s20_s17, 4   ;;  %s1032_s13 = smov %s717_s14 }
 0x15f   : > { %s1033_s14 = smov %s902_s30  ;;  %s1034_s15 = smov %s725_s16 }
 0x160   : > { %s1035_s16 = smov %s1037_s11  ;;  %19 = sbr.rel (!%p17_p11) target bundleno = 7 (0x7), region = 87 }
 0x167   :  { %354 = vsyncpa [#allocation3], 1 }
 0x168   :  { %356 = vsyncpa [#allocation3 + $0x1], 1 }
 0x169   :  { %357 = vsyncpa [#allocation6], 1 }
 0x16a   :  { %358 = vsyncpa [#allocation4], 1 }
 0x16b   :  { %360 = vsyncpa [#allocation4 + $0x1], 1 }

</bundles_post_ra>
